<compile_context>
chip_gen: v7x
topology: tpu7x:2x2x1
jax: 0.10.0
libtpu: 0.0.40
codegen_flags: <defaults>
</compile_context>

<pallas_src>
import functools
import math

import jax
import jax.numpy as jnp
from jax import lax
from jax.experimental import pallas as pl
from jax.experimental.pallas import tpu as pltpu

TEMPERATURE = 0.5
NORM_EPS = 1e-12  # matches F.normalize default eps


def _round_up(x, m):
    return ((x + m - 1) // m) * m


def _normalize_kernel(x_ref, o_ref, *, inv_sqrt_t):
    """Row L2-normalize (f32 math), fold 1/sqrt(T), emit bf16 for the MXU."""
    x = x_ref[...].astype(jnp.float32)
    sq = jnp.sum(x * x, axis=1, keepdims=True)                 # (TQ, 1)
    # rsqrt(max(||x||^2, eps^2)) clamps the *squared* norm; differs from
    # F.normalize's max(||x||, eps) only for pathologically tiny norms.
    inv = lax.rsqrt(jnp.maximum(sq, NORM_EPS * NORM_EPS))
    o_ref[...] = (x * (inv * inv_sqrt_t)).astype(o_ref.dtype)


def _ntxent_kernel(q_ref, k_ref, lab_ref, loss_ref, pos_acc, den_acc,
                   *, tk, shift, den_init, keys_resident):
    """Streams label (bf16) / key blocks; accumulates per-row pos / denom."""
    j = pl.program_id(1)

    @pl.when(j == 0)
    def _():
        pos_acc[...] = jnp.zeros_like(pos_acc)
        # den_init pre-subtracts the exp(0 - shift) contribution of every
        # zero-padded key row, so no per-tile key mask is needed.
        den_acc[...] = jnp.full_like(den_acc, den_init)

    if keys_resident:
        # Whole key matrix is VMEM-resident (DMA'd once); slice this tile.
        start = pl.multiple_of(j * tk, tk)
        k = k_ref[pl.ds(start, tk), :]
    else:
        k = k_ref[...]

    # bf16 operands, f32 accumulation on the MXU.  Operands were pre-scaled
    # by 1/sqrt(T), so `s` is already sim / T.
    s = lax.dot_general(
        q_ref[...], k,
        dimension_numbers=(((1,), (1,)), ((), ())),
        preferred_element_type=jnp.float32)                    # (TQ, TK)
    # shift = 1/T >= max(sim/T): exponent is always <= 0, no f32 overflow;
    # the constant cancels exactly in log(den) - log(pos).
    e = jnp.exp(s - shift)                                     # EUP, f32

    lab = lab_ref[...].astype(jnp.float32)
    pos_acc[...] += jnp.sum(e * lab, axis=1, keepdims=True)    # (TQ, 1)
    den_acc[...] += jnp.sum(e, axis=1, keepdims=True)          # (TQ, 1)

    @pl.when(j == pl.num_programs(1) - 1)
    def _():
        # -log(pos / den) == log(den) - log(pos)
        loss_ref[...] = jnp.log(den_acc[...]) - jnp.log(pos_acc[...])


def ntxent_loss(embedding, label, temperature=TEMPERATURE, reduction="mean"):
    """embedding: (N, D) float, label: (N, N) float. NTXent loss."""
    n, d = embedding.shape
    d_pad = max(_round_up(d, 128), 128)      # lane-dense contraction dim

    try:
        vmem_cap = int(pltpu.get_tpu_info().vmem_capacity_bytes)
    except Exception:  # conservative fallback (v7x per-TC size)
        vmem_cap = 64 * 1024 * 1024

    if n <= 512:
        # 32-multiple padding keeps bf16 blocks on native (16, 128) tiles and
        # guarantees >=2 row blocks so both v7x TensorCores get work.
        n_pad = _round_up(n, 32)
        tk = n_pad
        tq = n_pad // 2
    else:
        tq, tk = 512, 512                    # bigger TQ: less key traffic,
        n_pad = _round_up(n, 512)            # fewer grid steps, bigger MXU M

    x = embedding.astype(jnp.float32)
    if (n_pad, d_pad) != (n, d):
        x = jnp.pad(x, ((0, n_pad - n), (0, d_pad - d)))

    # Narrow label stream: bf16 is exact for 0/1 contrastive labels and
    # halves the dominant N^2 HBM traffic; pad AFTER the narrow cast so the
    # wrapper-side pad also moves half the bytes.
    lab = label.astype(jnp.bfloat16)
    if n_pad != n:
        lab = jnp.pad(lab, ((0, n_pad - n), (0, n_pad - n)))

    inv_sqrt_t = float(1.0 / (float(temperature) ** 0.5))
    shift = float(1.0 / float(temperature))
    # Each zero-padded key row contributes exp(0 - shift) to every row's
    # denominator; pre-subtract that exactly instead of masking per tile.
    den_init = float(-(n_pad - n) * math.exp(-shift))

    # ---- prologue: normalize rows once (not per (i, j) tile) ----
    xn = pl.pallas_call(
        functools.partial(_normalize_kernel, inv_sqrt_t=inv_sqrt_t),
        out_shape=jax.ShapeDtypeStruct((n_pad, d_pad), jnp.bfloat16),
        grid_spec=pltpu.PrefetchScalarGridSpec(
            num_scalar_prefetch=0,
            grid=(n_pad // tq,),
            in_specs=[pl.BlockSpec((tq, d_pad), lambda i: (i, 0))],
            out_specs=pl.BlockSpec((tq, d_pad), lambda i: (i, 0)),
        ),
        compiler_params=pltpu.CompilerParams(
            dimension_semantics=("parallel",)),
    )(x)

    # ---- main tiled kernel ----
    # Keep the full key matrix VMEM-resident when it fits a generation-aware
    # budget (~8 MiB data on v7x, ~16 MiB on v5e/v6e, incl. double buffer).
    keys_resident = (2 * n_pad * d_pad * 2) <= (vmem_cap // 4)
    if keys_resident:
        k_spec = pl.BlockSpec((n_pad, d_pad), lambda i, j: (0, 0))
        key_buf_bytes = 2 * n_pad * d_pad * 2
    else:
        k_spec = pl.BlockSpec((tk, d_pad), lambda i, j: (j, 0))
        key_buf_bytes = 2 * tk * d_pad * 2

    vmem_bytes = (2 * tq * d_pad * 2        # query blocks (bf16, 2 buffers)
                  + key_buf_bytes           # key (resident or streamed)
                  + 2 * tq * tk * 2         # label tiles (bf16, 2 buffers)
                  + 4 * tq * tk * 4         # s / e f32 intermediates
                  + 16 * tq * 4)            # accumulators + loss out
    vmem_limit = int(min(max(int(1.5 * vmem_bytes), 16 * 1024 * 1024),
                         (7 * vmem_cap) // 10))

    per_row = pl.pallas_call(
        functools.partial(_ntxent_kernel, tk=tk, shift=shift,
                          den_init=den_init, keys_resident=keys_resident),
        out_shape=jax.ShapeDtypeStruct((n_pad, 1), jnp.float32),
        grid_spec=pltpu.PrefetchScalarGridSpec(
            num_scalar_prefetch=0,
            grid=(n_pad // tq, n_pad // tk),
            in_specs=[
                pl.BlockSpec((tq, d_pad), lambda i, j: (i, 0)),   # query rows
                k_spec,                                           # keys
                pl.BlockSpec((tq, tk), lambda i, j: (i, j)),      # label tile
            ],
            out_specs=pl.BlockSpec((tq, 1), lambda i, j: (i, 0)),
            scratch_shapes=[pltpu.VMEM((tq, 1), jnp.float32),     # pos acc
                            pltpu.VMEM((tq, 1), jnp.float32)],    # den acc
        ),
        compiler_params=pltpu.CompilerParams(
            dimension_semantics=("parallel", "arbitrary"),
            vmem_limit_bytes=vmem_limit),
    )(xn, xn, lab)

    loss = per_row[:n, 0]
    if reduction == "mean":
        return jnp.mean(loss)
    if reduction == "sum":
        return jnp.sum(loss)
    if reduction == "none":
        return loss
    if reduction == "AvgNonInf":
        # inner > 0  <=>  pos > 0  <=>  per-row loss is finite
        finite = jnp.isfinite(loss)
        cnt = jnp.sum(finite)
        masked = jnp.sum(jnp.where(finite, loss, 0.0))
        return jnp.where(cnt > 0, masked / jnp.maximum(cnt, 1), jnp.mean(loss))
    raise ValueError("Unsupported reduction: %s" % reduction)


def _ntxent_ref(embedding, label, temperature=TEMPERATURE):
    # pure-JAX reference mirroring the PyTorch forward (reduction='mean')
    x = embedding.astype(jnp.float32)
    xn = x / jnp.maximum(jnp.linalg.norm(x, axis=1, keepdims=True), NORM_EPS)
    sim = jnp.exp((xn @ xn.T) / temperature)
    pos = jnp.sum(sim * label, axis=1)
    inner = pos / jnp.sum(sim, axis=1)
    return jnp.mean(-jnp.log(inner))


if __name__ == "__main__":
    key = jax.random.PRNGKey(0)
    k1, k2 = jax.random.split(key, 2)

    # Test 1: batch of 8 embeddings (4 positive pairs), D=32.
    N, D = 8, 32
    emb = jax.random.normal(k1, (N, D), dtype=jnp.float32)
    idx = jnp.arange(N)
    lab = (idx[:, None] == (idx[None, :] ^ 1)).astype(jnp.float32)  # (N, N)

    loss = jax.block_until_ready(ntxent_loss(emb, lab))
    ref = jax.block_until_ready(_ntxent_ref(emb, lab))
    # bf16 matmul operands -> looser tolerance than a pure-f32 path.
    assert jnp.allclose(loss, ref, rtol=2e-2, atol=2e-2), (loss, ref)

    # Test 2: unaligned shapes (N=6, D=20) exercise row/lane padding and the
    # constant denominator correction for zero-padded key rows.
    N2, D2 = 6, 20
    emb2 = jax.random.normal(k2, (N2, D2), dtype=jnp.float32)
    idx2 = jnp.arange(N2)
    lab2 = (idx2[:, None] == (idx2[None, :] ^ 1)).astype(jnp.float32)

    loss2 = jax.block_until_ready(ntxent_loss(emb2, lab2))
    ref2 = jax.block_until_ready(_ntxent_ref(emb2, lab2))
    assert jnp.allclose(loss2, ref2, rtol=2e-2, atol=2e-2), (loss2, ref2)

    print("KERNEL_OK")
</pallas_src>

<mosaic_0001>
module attributes {stable_mosaic.version = 11 : i64} {
  func.func @_normalize_kernel(%arg0: i32, %arg1: memref<16x128xf32, #tpu.memory_space<vmem>>, %arg2: memref<16x128xbf16, #tpu.memory_space<vmem>>) attributes {dimension_semantics = [#tpu.dimension_semantics<parallel>], iteration_bounds = array<i64: 2>, scalar_prefetch = 0 : i64, scratch_operands = 0 : i64, tpu.core_type = #tpu.core_type<tc>, window_params = [{transform_indices = @transform_0, window_bounds = array<i64: 16, 128>}, {transform_indices = @transform_1, window_bounds = array<i64: 16, 128>}]} {
    %c0 = arith.constant 0 : index
    %c0_0 = arith.constant 0 : index
    %0 = vector.load %arg1[%c0, %c0_0] : memref<16x128xf32, #tpu.memory_space<vmem>>, vector<16x128xf32>
    %1 = arith.mulf %0, %0 : vector<16x128xf32>
    %cst = arith.constant dense<0.000000e+00> : vector<16xf32>
    %2 = vector.multi_reduction <add>, %1, %cst [1] : vector<16x128xf32> to vector<16xf32>
    %3 = vector.shape_cast %2 : vector<16xf32> to vector<16x1xf32>
    %cst_1 = arith.constant 1.000000e-24 : f32
    %4 = vector.broadcast %cst_1 : f32 to vector<16x1xf32>
    %5 = arith.maximumf %3, %4 : vector<16x1xf32>
    %6 = math.rsqrt %5 : vector<16x1xf32>
    %cst_2 = arith.constant 1.41421354 : f32
    %7 = vector.broadcast %cst_2 : f32 to vector<16x1xf32>
    %8 = arith.mulf %6, %7 : vector<16x1xf32>
    %9 = vector.broadcast %8 : vector<16x1xf32> to vector<16x128xf32>
    %10 = arith.mulf %0, %9 : vector<16x128xf32>
    %11 = arith.truncf %10 : vector<16x128xf32> to vector<16x128xbf16>
    %c0_3 = arith.constant 0 : index
    %c0_4 = arith.constant 0 : index
    %12 = vector.load %arg2[%c0_3, %c0_4] : memref<16x128xbf16, #tpu.memory_space<vmem>>, vector<16x128xbf16>
    tpu.vector_store %arg2[%c0_3, %c0_4], %11 {strides = array<i32>} : memref<16x128xbf16, #tpu.memory_space<vmem>>, vector<16x128xbf16>,
    return
  }
  func.func @transform_0(%arg0: i32) -> (i32, i32) {
    %c0_i32 = arith.constant 0 : i32
    %c0_i32_0 = arith.constant 0 : i32
    return %arg0, %c0_i32 : i32, i32
  }
  func.func @transform_1(%arg0: i32) -> (i32, i32) {
    %c0_i32 = arith.constant 0 : i32
    %c0_i32_0 = arith.constant 0 : i32
    return %arg0, %c0_i32 : i32, i32
  }
}

</mosaic_0001>

<bundles_post_ra>
// kernel: tpu_custom_call.1
= control target key start
LH: loop header
LB: loop body
LE: loop exit
PB: predicated region body
PF: predicated region fallthrough
CT: control target
= control target key end

     0   :  { %6 = vsyncpa [#allocation3], 0  ;;  %s606_s0 = inlined_call_operand.hbm [shape: f32[32,128], index: 0, kind: input, shape index: {}]   ;;  %s607_s1 = inlined_call_operand.hbm [shape: bf16[32,128], index: 1, kind: output, shape index: {}]  }
   0x1   :  { %8 = vsyncpa [#allocation3 + $0x1], 0 }
   0x2   :  { %9 = vsyncpa [#allocation4], 0 }
   0x3   :  { %11 = vsyncpa [#allocation4 + $0x1], 0  ;;  %s443_s6 = smov 0   ;;  %s445_s7 = smov 0  }
   0x4   :  { %s447_s8 = smov 0   ;;  %s449_s9 = smov 0  }
   0x5 LB: > { %s464_s10 = sadd.s32 4294967295, %s425_s9   ;;  %s250_s11 = sadd.s32 4294967294, %s425_s9   ;;  %s425_s9 = sphi %s449_s9, %s620_s9   ;;  %s421_s8 = sphi %s447_s8, %s619_s8   ;;  %s417_s7 = sphi %s445_s7, %s618_s7   ;;  %s413_s6 = sphi %s443_s6, %s617_s6  }
   0x6   : > { %s468_s12 = sadd.s32 1, %s425_s9   ;;  %s24_s13 = sadd.s32 1, %s421_s8 }
   0x7   : > { %s21_s14 = ssub.s32 %s425_s9, %s468_s12  ;;  %p31_p0 = scmp.ne.s32.totalorder %s421_s8, %s417_s7 }
   0x8   : > { %p22_p1 = scmp.eq.s32.totalorder %s21_s14, 0  ;;  %p32_p2 = scmp.eq.s32.totalorder %s425_s9, 0 }
   0x9   : > { %p37_p3 = scmp.ne.s32.totalorder %s417_s7, %s413_s6  ;;  %p38_p4 = scmp.eq.s32.totalorder %s464_s10, 0 }
   0xa   : > { %s480_s15 = scalar_select %p22_p1, %s421_s8, %s24_s13  }
   0xb   : > { %p482_p5 = por %p32_p2, %p31_p0  ;;  %p486_p6 = por %p38_p4, %p37_p3 }
   0xc   : > { %p61_p7 = scmp.eq.s32.totalorder %s464_s10, 1  ;;  %p67_p8 = scmp.eq.s32.totalorder %s250_s11, 1 }
   0xd   : > { %p287_p10 = scmp.lt.s32.totalorder %s425_s9, 2  ;;  %s87_s20 = sand.u32 1, %s421_s8  }
   0xe   : > { %p493_p11 = por %p61_p7, %p31_p0  ;;  %p497_p12 = por %p67_p8, %p37_p3 }
   0xf   : > { %s266_s21 = sshll.u32 %s425_s9, 8  ;;  %s253_s22 = sshll.u32 %s87_s20, 4 }
  0x10   : > { %s611_s18 = scalar_select %p493_p11, 1, 0 }
  0x11   : > { %s612_s19 = scalar_select %p497_p12, 1, 0 }
  0x12   : > { %s506_s25 = scalar_lea.hbm %s606_s0, %s266_s21  ;;  %s91_s26 = scalar_lea.vmem [#allocation2], %s253_s22 }
  0x13   : > { %s98_s27 = sshll.u32 %s91_s26, 4  ;;  %p510_p13 = pnand %p287_p10, %p482_p5  ;;  %s514_s27 = int_to_ptr.vmem [resolvable:$true] %s98_s27 }
  0x14   : > { %s516_s29 = scalar_lea.sflag [#allocation3], %s87_s20  ;;  %s329_s30 = scalar_lea.hbm %s506_s25, 256 }
  0x15   : > { %p330_p0 = scmp.ne.s32.totalorder %s506_s25, %s329_s30  ;;  %p331_p1 = pneg %p510_p13 }
  0x16   : > { %s334_s4 = scalar_lea.hbm %s606_s0, 512  ;;  %p335_p4 = scmp.lt.u32.totalorder %s506_s25, %s606_s0 }
  0x17   : > { %p332_p2 = pnand %p331_p1, %p330_p0  ;;  %p336_p5 = scmp.lt.u32.totalorder %s334_s4, %s329_s30 }
  0x18   : > { %p338_p8 = scmp.lt.u32.totalorder %s329_s30, %s506_s25 }
  0x19   : > { %p333_p3 = pneg %p332_p2  ;;  %p337_p7 = por %p336_p5, %p335_p4 }
  0x1b   : > { %p339_p10 = por %p338_p8, %p337_p7 }
  0x1d   : > { %p340_p9 = pnand %p339_p10, %p333_p3 }
  0x1f   : > { %343 = shalt.err (!%p340_p9)
}
  0x20   : > { %s344_s13 = scalar_lea.vmem %s514_s27, 256  ;;  %s427_s14 = smov [#allocation2]  }
  0x21   : > { %p345_p0 = scmp.ne.s32.totalorder %s514_s27, %s344_s13  ;;  %s349_s16 = sshll.u32 %s427_s14, 4  ;;  %s350_s16 = int_to_ptr.vmem [resolvable:$false] %s349_s16 }
  0x22   : > { %s351_s20 = scalar_lea.vmem %s350_s16, 512  ;;  %p352_p11 = scmp.lt.s32.totalorder %s514_s27, %s350_s16 }
  0x23   : > { %p347_p2 = pnand %p345_p0, %p331_p1  ;;  %p353_p4 = scmp.lt.s32.totalorder %s351_s20, %s344_s13 }
  0x25   : > { %p348_p12 = pneg %p347_p2  ;;  %p354_p5 = por %p353_p4, %p352_p11 }
  0x27   : > { %p355_p7 = pnand %p354_p5, %p348_p12 }
  0x29   : > { %358 = shalt.err (!%p355_p7)
}
  0x2a   : > { %s428_s21 = smov 128   ;;  %s429_s22 = smov 8  }
  0x2b   : > { %282 = dma.hbm_to_vmem [thread:$0]  (!%p510_p13), %s506_s25, 256, %s514_s27, %s516_s29, %s428_s21, %s428_s21, %s429_s22  }
  0x2c   : > { %p256_p9 = scmp.ge.s32.totalorder %s425_s9, 1  ;;  %p106_p1 = scmp.lt.s32.totalorder %s425_s9, 3 }
  0x2e   : > { %p107_p3 = pnand %p256_p9, %p106_p1 }
  0x2f   : > { %s547_s23 = sand.u32 (!%p107_p3), 1, %s417_s7  }
  0x30   : > { %110 = sbr.rel (%p107_p3) target bundleno = 239 (0xef), region = 24  ;;  %s257_s24 = sshll.u32 (!%p107_p3), %s547_s23, 4 }
  0x31   : > { %s113_s26 = scalar_lea.sflag (!%p107_p3), [#allocation3], %s547_s23  ;;  %s116_s30 = scalar_lea.vmem (!%p107_p3), [#allocation2], %s257_s24 }
  0x37   : > { %404 = dma.done.wait (%p486_p6), %s113_s26, 256  }
  0x38   : > { %406 = vsyncadd (%p486_p6), %s113_s26, 4294967040  ;;  %v137_v0 = vld [vmem:[%s116_s30] sm:$0xff]  ;;  %v138_v1 = vld [vmem:[%s116_s30 + $0x8] sm:$0xff]  ;;  %s258_s25 = sshll.u32 %s547_s23, 3  ;;  %s269_s17 = sshll.u32 %s464_s10, 7 }
  0x39   : > { %v139_v2 = vmul.f32 %v137_v0, %v137_v0  ;;  %v140_v3 = vmul.f32 %v138_v1, %v138_v1  ;;  %s134_s27 = scalar_lea.vmem [#allocation5], %s258_s25  ;;  %s560_s3 = scalar_lea.hbm %s607_s1, %s269_s17 }
  0x3a   : > { %s177_s28 = sshll.u32 %s134_s27, 4  ;;  %s164_s4 = scalar_lea.sflag [#allocation4], %s547_s23  ;;  %s562_s28 = int_to_ptr.vmem [resolvable:$true] %s177_s28 }
  0x3b   : > { %141 = vadd.xlane.f32.xlu0 %v139_v2  ;;  %s359_s5 = scalar_lea.vmem %s562_s28, 128  ;;  %p614_p11 = scmp.ne.s32.totalorder %s611_s18, 0 }
  0x3c   : > { %p360_p6 = scmp.ne.s32.totalorder %s562_s28, %s359_s5  ;;  %s430_s10 = smov [#allocation5]  }
  0x3d   : > { %s363_s11 = sshll.u32 %s430_s10, 4  ;;  %s364_s11 = int_to_ptr.vmem [resolvable:$false] %s363_s11 }
  0x3e   : > { %p361_p12 = pnand %p360_p6, %p614_p11  ;;  %s365_s13 = scalar_lea.vmem %s364_s11, 256 }
  0x3f   : > { %143 = vadd.xlane.f32.xlu0 %v140_v3  ;;  %p366_p8 = scmp.lt.s32.totalorder %s562_s28, %s364_s11  ;;  %p367_p10 = scmp.lt.s32.totalorder %s365_s13, %s359_s5 }
  0x40   : > { %p362_p13 = pneg %p361_p12 }
  0x41   : > { %p368_p0 = por %p367_p10, %p366_p8 }
  0x43   : > { %p369_p2 = pnand %p368_p0, %p362_p13 }
  0xc8   : > { %v142_v4 = vpop.xlane.xlu0 %141 }
  0xc9   : > { %v145_v5 = vmax.f32 %v142_v4, 1e-24 }
  0xcb   : > { %325 = vrsqrt.f32 %v145_v5 }
  0xcc   : > { %v144_v6 = vpop.xlane.xlu0 %143 }
  0xcd   : > { %v146_v7 = vmax.f32 %v144_v6, 1e-24 }
  0xcf   : > { %327 = vrsqrt.f32 %v146_v7 }
  0xd5   : > { %v326_v8 = vpop.eup %325 }
  0xd6   : > { %v149_v9 = vmul.f32 1.4142135, %v326_v8 }
  0xd8   : > { %v151_v12 = vmul.f32 %v149_v9, %v137_v0 }
  0xd9   : > { %v328_v10 = vpop.eup %327 }
  0xda   : > { %v150_v11 = vmul.f32 1.4142135, %v328_v10 }
  0xdc   : > { %v152_v13 = vmul.f32 %v150_v11, %v138_v1 }
  0xde   : > { %v273_v14 = vpack.c.bf16 %v152_v13, %v151_v12 }
  0xe0   : > { %274 = vst [vmem:[%s134_s27] sm:$0xff] %v273_v14  }
  0xe1   : > { %372 = shalt.err (!%p369_p2)
}
  0xe2   : > { %s373_s14 = scalar_lea.hbm %s560_s3, 128  ;;  %s377_s21 = scalar_lea.hbm %s607_s1, 256 }
  0xe3   : > { %p374_p4 = scmp.ne.s32.totalorder %s560_s3, %s373_s14  ;;  %p378_p9 = scmp.lt.u32.totalorder %s560_s3, %s607_s1 }
  0xe4   : > { %p379_p1 = scmp.lt.u32.totalorder %s377_s21, %s373_s14  ;;  %p381_p6 = scmp.lt.u32.totalorder %s373_s14, %s560_s3 }
  0xe5   : > { %p375_p5 = pnand %p374_p4, %p614_p11 }
  0xe6   : > { %p380_p3 = por %p379_p1, %p378_p9 }
  0xe7   : > { %p376_p7 = pneg %p375_p5 }
  0xe8   : > { %p382_p12 = por %p381_p6, %p380_p3 }
  0xea   : > { %p383_p13 = pnand %p382_p12, %p376_p7 }
  0xec   : > { %386 = shalt.err (!%p383_p13)
}
  0xed   : > { %s431_s26 = smov 64   ;;  %s432_s30 = smov 4  }
  0xee   : > { %277 = dma.vmem_to_hbm [thread:$0]  (%p614_p11), %s562_s28, 128, %s560_s3, %s164_s4, %s431_s26, %s431_s26, %s432_s30  }
  0xef PF: > { %s192_s25 = sand.u32 1, %s413_s6   ;;  %p615_p8 = scmp.ne.s32.totalorder %s612_s19, 0 }
  0xf0   : > { %p616_p10 = scmp.ge.s32.totalorder %s425_s9, 2  ;;  %s193_s17 = scalar_lea.sflag [#allocation4], %s192_s25 }
  0xf2   : > { %p284_p0 = pnand %p616_p10, %p615_p8 }
  0xf4   : > { %408 = dma.done.wait (!%p284_p0), %s193_s17, 128  }
  0xf5   : > { %410 = vsyncadd (!%p284_p0), %s193_s17, 4294967168  ;;  %p14_p2 = scmp.ge.s32.totalorder %s468_s12, 4   ;;  %s617_s6 = smov %s417_s7 }
  0xf6   : > { %s618_s7 = smov %s421_s8  ;;  %s619_s8 = smov %s480_s15 }
  0xf7   : > { %s620_s9 = smov %s468_s12  ;;  %16 = sbr.rel (!%p14_p2) target bundleno = 5 (0x5), region = 69 }
  0xfe   :  { %198 = vsyncpa [#allocation3], 1 }
  0xff   :  { %200 = vsyncpa [#allocation3 + $0x1], 1 }
 0x100   :  { %201 = vsyncpa [#allocation4], 1 }
 0x101   :  { %203 = vsyncpa [#allocation4 + $0x1], 1 }

</bundles_post_ra>
